<compile_context>
chip_gen: v7x
topology: tpu7x:2x2x1
jax: 0.10.0
libtpu: 0.0.40
codegen_flags: <defaults>
</compile_context>

<pallas_src>
import jax
import jax.numpy as jnp
from jax.experimental import pallas as pl
from jax.experimental.pallas import tpu as pltpu


def _round_up(n, m):
    return ((n + m - 1) // m) * m


def scorer_kernel(x_ref, y_ref, w1a_ref, w1b_ref, b1_ref, w2_ref, b2_ref,
                  out_ref):
    # First layer: two MXU matmuls (split concatenation), f32 accumulation.
    h = jnp.dot(x_ref[...], w1a_ref[...], preferred_element_type=jnp.float32)
    h = h + jnp.dot(y_ref[...], w1b_ref[...],
                    preferred_element_type=jnp.float32)
    h = jnp.tanh(h + b1_ref[...])                        # (tile_b, hidden) f32

    # Second layer: dot-with-a-vector as VPU mul + XLU lane reduce; keeps the
    # MXU free and yields a lane-dense output row.
    logits = jnp.sum(h * w2_ref[...], axis=1) + b2_ref[0]      # (tile_b,)
    out_ref[...] = jax.nn.sigmoid(logits).reshape(1, 1, -1)    # (1, 1, tile_b)


def scorer_forward(x, y, w1t, b1, w2t, b2, *, tile_b=512,
                   compute_dtype=jnp.bfloat16):
    """x, y: (B, input_size // 2) each.  Weights are stored transposed w.r.t.
    torch, i.e. w1t: (input_size, hidden), w2t: (hidden, 1).  Returns sigmoid
    scores of shape (B,) (0-d for B == 1, matching torch's .squeeze())."""
    B, in_half = x.shape
    assert y.shape == (B, in_half)
    in_size = 2 * in_half
    hidden = w1t.shape[1]
    assert w1t.shape == (in_size, hidden)
    assert tile_b % 8 == 0

    # Pick the batch tile: big tiles amortise per-step overhead and fill MXU
    # rows; shrink for small batches so we never over-pad.
    b8 = _round_up(B, 8)
    tb = b8 if b8 <= tile_b else tile_b
    b_pad = _round_up(B, tb)
    if b_pad != B:
        pad = ((0, b_pad - B), (0, 0))
        x = jnp.pad(x, pad)
        y = jnp.pad(y, pad)

    # bf16 for MXU inputs; f32 everywhere else.
    x = x.astype(compute_dtype)
    y = y.astype(compute_dtype)
    w1a = w1t[:in_half].astype(compute_dtype)            # (in_half, hidden)
    w1b = w1t[in_half:].astype(compute_dtype)            # (in_half, hidden)
    b1_row = b1.reshape(1, hidden).astype(jnp.float32)
    w2_row = w2t.reshape(1, hidden).astype(jnp.float32)
    b2_s = b2.reshape(1).astype(jnp.float32)

    grid_b = b_pad // tb

    out = pl.pallas_call(
        scorer_kernel,
        out_shape=jax.ShapeDtypeStruct((grid_b, 1, tb), jnp.float32),
        grid_spec=pltpu.PrefetchScalarGridSpec(
            num_scalar_prefetch=0,
            grid=(grid_b,),
            in_specs=[
                pl.BlockSpec((tb, in_half), lambda i: (i, 0)),       # x tile
                pl.BlockSpec((tb, in_half), lambda i: (i, 0)),       # y tile
                pl.BlockSpec((in_half, hidden), lambda i: (0, 0)),   # W1a (resident)
                pl.BlockSpec((in_half, hidden), lambda i: (0, 0)),   # W1b (resident)
                pl.BlockSpec((1, hidden), lambda i: (0, 0)),         # b1 (resident)
                pl.BlockSpec((1, hidden), lambda i: (0, 0)),         # w2 row (resident)
                pl.BlockSpec(memory_space=pltpu.MemorySpace.SMEM),   # b2 scalar
            ],
            out_specs=pl.BlockSpec((1, 1, tb), lambda i: (i, 0, 0)),
        ),
        compiler_params=pltpu.CompilerParams(
            dimension_semantics=("parallel",)),
    )(x, y, w1a, w1b, b1_row, w2_row, b2_s)

    scores = out.reshape(b_pad)[:B]
    return jnp.squeeze(scores)   # (B,); 0-d for B == 1 (matches torch .squeeze())


def reference_forward(x, y, w1t, b1, w2t, b2, compute_dtype=jnp.bfloat16):
    xy = jnp.concatenate((x, y), axis=1)
    h = jnp.tanh(
        jnp.dot(xy.astype(compute_dtype), w1t.astype(compute_dtype),
                preferred_element_type=jnp.float32) + b1)
    logit = h @ w2t.astype(jnp.float32) + b2
    return jnp.squeeze(jax.nn.sigmoid(logit))


if __name__ == "__main__":
    # Small, TPU-friendly shapes: input_size=256 -> hidden=128, batch=8.
    input_size = 256
    hidden = input_size // 2
    batch = 8

    key = jax.random.PRNGKey(0)
    kx, ky, kw1, kb1, kw2, kb2 = jax.random.split(key, 6)

    x = jax.random.normal(kx, (batch, input_size // 2), dtype=jnp.float32)
    y = jax.random.normal(ky, (batch, input_size // 2), dtype=jnp.float32)

    # Deterministic parameter init (torch-Linear-like uniform bounds).
    bound1 = 1.0 / (input_size ** 0.5)
    w1t = jax.random.uniform(kw1, (input_size, hidden), jnp.float32, -bound1, bound1)
    b1 = jax.random.uniform(kb1, (hidden,), jnp.float32, -bound1, bound1)
    bound2 = 1.0 / (hidden ** 0.5)
    w2t = jax.random.uniform(kw2, (hidden, 1), jnp.float32, -bound2, bound2)
    b2 = jax.random.uniform(kb2, (1,), jnp.float32, -bound2, bound2)

    out = scorer_forward(x, y, w1t, b1, w2t, b2)
    jax.block_until_ready(out)
    ref = reference_forward(x, y, w1t, b1, w2t, b2)
    assert out.shape == (batch,)
    assert jnp.allclose(out, ref, atol=2e-3, rtol=2e-3)

    # Ragged batch: exercises the zero-padding path and torch-style squeeze.
    out5 = scorer_forward(x[:5], y[:5], w1t, b1, w2t, b2)
    jax.block_until_ready(out5)
    ref5 = reference_forward(x[:5], y[:5], w1t, b1, w2t, b2)
    assert out5.shape == (5,)
    assert jnp.allclose(out5, ref5, atol=2e-3, rtol=2e-3)

    print("KERNEL_OK")
</pallas_src>

<mosaic_0001>
module attributes {stable_mosaic.version = 11 : i64} {
  func.func @scorer_kernel(%arg0: i32, %arg1: memref<8x128xbf16, #tpu.memory_space<vmem>>, %arg2: memref<8x128xbf16, #tpu.memory_space<vmem>>, %arg3: memref<128x128xbf16, #tpu.memory_space<vmem>>, %arg4: memref<128x128xbf16, #tpu.memory_space<vmem>>, %arg5: memref<1x128xf32, #tpu.memory_space<vmem>>, %arg6: memref<1x128xf32, #tpu.memory_space<vmem>>, %arg7: memref<1xf32, #tpu.memory_space<smem>>, %arg8: memref<1x1x8xf32, #tpu.memory_space<vmem>>) attributes {dimension_semantics = [#tpu.dimension_semantics<parallel>], iteration_bounds = array<i64: 1>, scalar_prefetch = 0 : i64, scratch_operands = 0 : i64, tpu.core_type = #tpu.core_type<tc>, window_params = [{transform_indices = @transform_0, window_bounds = array<i64: 8, 128>}, {transform_indices = @transform_1, window_bounds = array<i64: 8, 128>}, {pipeline_mode = #tpu.pipeline_mode<synchronous>, transform_indices = @transform_2, window_bounds = array<i64: 128, 128>}, {pipeline_mode = #tpu.pipeline_mode<synchronous>, transform_indices = @transform_3, window_bounds = array<i64: 128, 128>}, {pipeline_mode = #tpu.pipeline_mode<synchronous>, transform_indices = @transform_4, window_bounds = array<i64: 1, 128>}, {pipeline_mode = #tpu.pipeline_mode<synchronous>, transform_indices = @transform_5, window_bounds = array<i64: 1, 128>}, {transform_indices = @transform_6, window_bounds = array<i64: 1>}, {transform_indices = @transform_7, window_bounds = array<i64: 1, 1, 8>}]} {
    %c0 = arith.constant 0 : index
    %c0_0 = arith.constant 0 : index
    %0 = vector.load %arg1[%c0, %c0_0] : memref<8x128xbf16, #tpu.memory_space<vmem>>, vector<8x128xbf16>
    %c0_1 = arith.constant 0 : index
    %c0_2 = arith.constant 0 : index
    %1 = vector.load %arg3[%c0_1, %c0_2] : memref<128x128xbf16, #tpu.memory_space<vmem>>, vector<128x128xbf16>
    %cst = arith.constant dense<0.000000e+00> : vector<8x128xf32>
    %2 = tpu.matmul %0, %1, %cst {dimension_numbers = #tpu.dot_dimension_numbers<[1], [0], [0], [1], [0, 0, 1, 1], [], []>} : vector<8x128xbf16>, vector<128x128xbf16>, vector<8x128xf32> -> vector<8x128xf32>
    %c0_3 = arith.constant 0 : index
    %c0_4 = arith.constant 0 : index
    %3 = vector.load %arg2[%c0_3, %c0_4] : memref<8x128xbf16, #tpu.memory_space<vmem>>, vector<8x128xbf16>
    %c0_5 = arith.constant 0 : index
    %c0_6 = arith.constant 0 : index
    %4 = vector.load %arg4[%c0_5, %c0_6] : memref<128x128xbf16, #tpu.memory_space<vmem>>, vector<128x128xbf16>
    %cst_7 = arith.constant dense<0.000000e+00> : vector<8x128xf32>
    %5 = tpu.matmul %3, %4, %cst_7 {dimension_numbers = #tpu.dot_dimension_numbers<[1], [0], [0], [1], [0, 0, 1, 1], [], []>} : vector<8x128xbf16>, vector<128x128xbf16>, vector<8x128xf32> -> vector<8x128xf32>
    %6 = arith.addf %2, %5 : vector<8x128xf32>
    %c0_8 = arith.constant 0 : index
    %c0_9 = arith.constant 0 : index
    %7 = vector.load %arg5[%c0_8, %c0_9] : memref<1x128xf32, #tpu.memory_space<vmem>>, vector<1x128xf32>
    %8 = vector.broadcast %7 : vector<1x128xf32> to vector<8x128xf32>
    %9 = arith.addf %6, %8 : vector<8x128xf32>
    %10 = math.tanh %9 : vector<8x128xf32>
    %c0_10 = arith.constant 0 : index
    %c0_11 = arith.constant 0 : index
    %11 = vector.load %arg6[%c0_10, %c0_11] : memref<1x128xf32, #tpu.memory_space<vmem>>, vector<1x128xf32>
    %12 = vector.broadcast %11 : vector<1x128xf32> to vector<8x128xf32>
    %13 = arith.mulf %10, %12 : vector<8x128xf32>
    %cst_12 = arith.constant dense<0.000000e+00> : vector<8xf32>
    %14 = vector.multi_reduction <add>, %13, %cst_12 [1] : vector<8x128xf32> to vector<8xf32>
    %c0_13 = arith.constant 0 : index
    %15 = memref.load %arg7[%c0_13] : memref<1xf32, #tpu.memory_space<smem>>
    %16 = vector.broadcast %15 : f32 to vector<8xf32>
    %17 = arith.addf %14, %16 : vector<8xf32>
    %18 = arith.negf %17 : vector<8xf32>
    %19 = math.exp %18 : vector<8xf32>
    %cst_14 = arith.constant 1.000000e+00 : f32
    %20 = vector.broadcast %cst_14 : f32 to vector<8xf32>
    %21 = arith.addf %20, %19 : vector<8xf32>
    %22 = arith.divf %20, %21 : vector<8xf32>
    %23 = vector.shape_cast %22 : vector<8xf32> to vector<1x1x8xf32>
    %c0_15 = arith.constant 0 : index
    %c0_16 = arith.constant 0 : index
    %c0_17 = arith.constant 0 : index
    %24 = vector.load %arg8[%c0_15, %c0_16, %c0_17] : memref<1x1x8xf32, #tpu.memory_space<vmem>>, vector<1x1x8xf32>
    tpu.vector_store %arg8[%c0_15, %c0_16, %c0_17], %23 {strides = array<i32>} : memref<1x1x8xf32, #tpu.memory_space<vmem>>, vector<1x1x8xf32>,
    return
  }
  func.func @transform_0(%arg0: i32) -> (i32, i32) {
    %c0_i32 = arith.constant 0 : i32
    %c0_i32_0 = arith.constant 0 : i32
    return %arg0, %c0_i32 : i32, i32
  }
  func.func @transform_1(%arg0: i32) -> (i32, i32) {
    %c0_i32 = arith.constant 0 : i32
    %c0_i32_0 = arith.constant 0 : i32
    return %arg0, %c0_i32 : i32, i32
  }
  func.func @transform_2(%arg0: i32) -> (i32, i32) {
    %c0_i32 = arith.constant 0 : i32
    %c0_i32_0 = arith.constant 0 : i32
    %c0_i32_1 = arith.constant 0 : i32
    return %c0_i32, %c0_i32_0 : i32, i32
  }
  func.func @transform_3(%arg0: i32) -> (i32, i32) {
    %c0_i32 = arith.constant 0 : i32
    %c0_i32_0 = arith.constant 0 : i32
    %c0_i32_1 = arith.constant 0 : i32
    return %c0_i32, %c0_i32_0 : i32, i32
  }
  func.func @transform_4(%arg0: i32) -> (i32, i32) {
    %c0_i32 = arith.constant 0 : i32
    %c0_i32_0 = arith.constant 0 : i32
    %c0_i32_1 = arith.constant 0 : i32
    return %c0_i32, %c0_i32_0 : i32, i32
  }
  func.func @transform_5(%arg0: i32) -> (i32, i32) {
    %c0_i32 = arith.constant 0 : i32
    %c0_i32_0 = arith.constant 0 : i32
    %c0_i32_1 = arith.constant 0 : i32
    return %c0_i32, %c0_i32_0 : i32, i32
  }
  func.func @transform_6(%arg0: i32) -> i32 {
    %c0_i32 = arith.constant 0 : i32
    %c0_i32_0 = arith.constant 0 : i32
    return %c0_i32 : i32
  }
  func.func @transform_7(%arg0: i32) -> (i32, i32, i32) {
    %c0_i32 = arith.constant 0 : i32
    %c0_i32_0 = arith.constant 0 : i32
    %c0_i32_1 = arith.constant 0 : i32
    return %arg0, %c0_i32, %c0_i32_0 : i32, i32, i32
  }
}

</mosaic_0001>

<bundles_post_ra>
// kernel: tpu_custom_call.1
= control target key start
LH: loop header
LB: loop body
LE: loop exit
PB: predicated region body
PF: predicated region fallthrough
CT: control target
= control target key end

     0   :  { %13 = vsyncpa [#allocation4], 0  ;;  %s647_s0 = inlined_call_operand.hbm [shape: bf16[8,128], index: 0, kind: input, shape index: {}]   ;;  %s648_s1 = inlined_call_operand.vmem [shape: bf16[8,128], index: 1, kind: input, shape index: {}]   ;;  %s649_s2 = inlined_call_operand.hbm [shape: bf16[128,128], index: 2, kind: input, shape index: {}]   ;;  %s650_s3 = inlined_call_operand.hbm [shape: bf16[128,128], index: 3, kind: input, shape index: {}]   ;;  %s651_s4 = inlined_call_operand.vmem [shape: f32[1,128], index: 4, kind: input, shape index: {}]   ;;  %s652_s5 = inlined_call_operand.vmem [shape: f32[1,128], index: 5, kind: input, shape index: {}]   ;;  %s653_s6 = inlined_call_operand.<no memory space> [shape: f32[1], index: 6, kind: input, shape index: {}]   ;;  %s654_s7 = inlined_call_operand.hbm [shape: f32[1,1,8], index: 7, kind: output, shape index: {}]  }
   0x1   :  { %14 = vsyncpa [#allocation7], 0 }
   0x2   :  { %15 = vsyncpa [#allocation5], 0  ;;  %s533_s24 = smov [#allocation6]   ;;  %s439_s28 = scalar_lea.hbm %s649_s2, 1024 }
   0x3   :  { %s33_s25 = sshll.u32 %s533_s24, 4  ;;  %p440_p0 = scmp.ne.s32.totalorder %s649_s2, %s439_s28  ;;  %s34_s25 = int_to_ptr.vmem [resolvable:$true] %s33_s25 }
   0x4   :  { %p443_p1 = scmp.lt.u32.totalorder %s439_s28, %s649_s2 }
   0x6   :  { %p445_p2 = pnand %p443_p1, %p440_p0 }
   0x8   :  { %448 = shalt.err (!%p445_p2)
}
   0x9   :  { %s449_s10 = scalar_lea.vmem %s34_s25, 1024  ;;  %p454_p4 = scmp.lt.s32.totalorder %s34_s25, %s34_s25 }
   0xa   :  { %p450_p3 = scmp.ne.s32.totalorder %s34_s25, %s449_s10  ;;  %p455_p5 = scmp.lt.s32.totalorder %s449_s10, %s449_s10 }
   0xc   :  { %p456_p6 = por %p455_p5, %p454_p4 }
   0xe   :  { %p457_p7 = pnand %p456_p6, %p450_p3 }
  0x10   :  { %460 = shalt.err (!%p457_p7)
}
  0x11   :  { %s534_s11 = smov 64   ;;  %s535_s12 = smov 4  }
  0x12   :  { %39 = dma.hbm_to_vmem [thread:$0]  %s649_s2, 1024, %s34_s25, [#allocation7], %s534_s11, %s534_s11, %s535_s12  }
  0x13   :  { %s536_s15 = smov [#allocation3]   ;;  %s537_s17 = smov [#allocation8]  }
  0x14   :  { %s22_s16 = sshll.u32 %s536_s15, 4  ;;  %s45_s18 = sshll.u32 %s537_s17, 4  ;;  %s23_s16 = int_to_ptr.vmem [resolvable:$true] %s22_s16  ;;  %s46_s18 = int_to_ptr.vmem [resolvable:$true] %s45_s18 }
  0x15   :  { %s461_s21 = scalar_lea.hbm %s647_s0, 64 }
  0x16   :  { %p462_p8 = scmp.ne.s32.totalorder %s647_s0, %s461_s21  ;;  %p465_p9 = scmp.lt.u32.totalorder %s461_s21, %s647_s0 }
  0x18   :  { %p467_p10 = pnand %p465_p9, %p462_p8 }
  0x1a   :  { %470 = shalt.err (!%p467_p10)
}
  0x1b   :  { %s471_s2 = scalar_lea.vmem %s23_s16, 64  ;;  %p476_p12 = scmp.lt.s32.totalorder %s23_s16, %s23_s16 }
  0x1c   :  { %p472_p11 = scmp.ne.s32.totalorder %s23_s16, %s471_s2  ;;  %p477_p13 = scmp.lt.s32.totalorder %s471_s2, %s471_s2 }
  0x1e   :  { %p478_p0 = por %p477_p13, %p476_p12 }
  0x20   :  { %p479_p1 = pnand %p478_p0, %p472_p11 }
  0x22   :  { %482 = shalt.err (!%p479_p1)
}
  0x23   :  { %25 = dma.hbm_to_vmem [thread:$0]  %s647_s0, 64, %s23_s16, [#allocation4]  }
  0x24   :  { %s483_s30 = scalar_lea.hbm %s650_s3, 1024 }
  0x25   :  { %p484_p2 = scmp.ne.s32.totalorder %s650_s3, %s483_s30  ;;  %p487_p3 = scmp.lt.u32.totalorder %s483_s30, %s650_s3 }
  0x27   :  { %p489_p4 = pnand %p487_p3, %p484_p2 }
  0x29   :  { %492 = shalt.err (!%p489_p4)
}
  0x2a   :  { %s493_s14 = scalar_lea.vmem %s46_s18, 1024  ;;  %p498_p6 = scmp.lt.s32.totalorder %s46_s18, %s46_s18 }
  0x2b   :  { %p494_p5 = scmp.ne.s32.totalorder %s46_s18, %s493_s14  ;;  %p499_p7 = scmp.lt.s32.totalorder %s493_s14, %s493_s14 }
  0x2d   :  { %p500_p8 = por %p499_p7, %p498_p6 }
  0x2f   :  { %p501_p9 = pnand %p500_p8, %p494_p5 }
  0x31   :  { %504 = shalt.err (!%p501_p9)
}
  0x32   :  { %51 = dma.hbm_to_vmem [thread:$0]  %s650_s3, 1024, %s46_s18, [#allocation7], %s534_s11, %s534_s11, %s535_s12  }
  0x33   :  { %527 = dma.done.wait [#allocation4], 64  }
  0x34   :  { %528 = vsyncadd [#allocation4], 4294967232 }
  0x35   :  { %529 = dma.done.wait [#allocation7], 2048  }
  0x36   :  { %530 = vsyncadd [#allocation7], 4294965248  ;;  %v538_v0 = vmov 0.0   ;;  %vm539_vm0 = vmmov 0   ;;  %v417_v1 = vld [vmem:[#allocation8] sm:$0xff]   ;;  %v419_v3 = vld [vmem:[#allocation8 + $0x8] sm:$0xff]   ;;  %v298_v33 = vstv %s653_s6  ;;  %v307_v39 = vlaneseq }
  0x37   :  { %369 = vmatprep.subr.bf16.mxu0 %v538_v0  ;;  %389 = vmatprep.subr.bf16.mxu1 %v538_v0  ;;  %v418_v2 = vld [vmem:[#allocation6] sm:$0xff]   ;;  %v420_v4 = vld [vmem:[#allocation6 + $0x8] sm:$0xff]   ;;  %v421_v5 = vld [vmem:[#allocation8 + $0x10] sm:$0xff]   ;;  %vm314_vm1 = vcmask 57344  }
  0x38   :  { %385 = vmatprep.mubr.msk.bf16.mxu0 %vm539_vm0, %v538_v0  ;;  %405 = vmatprep.mubr.msk.bf16.mxu1 %vm539_vm0, %v538_v0  ;;  %v422_v6 = vld [vmem:[#allocation6 + $0x10] sm:$0xff]   ;;  %v423_v7 = vld [vmem:[#allocation8 + $0x18] sm:$0xff]   ;;  %v425_v9 = vld [vmem:[#allocation8 + $0x20] sm:$0xff]   ;;  %v308_v40 = vand.u32 127, %v307_v39  ;;  %v310_v41 = vshrl.u32 %v307_v39, 7 }
  0x39   :  { %370 = vmatpush3.bf16.msra.mxu0 %v417_v1  ;;  %390 = vmatpush3.bf16.msra.mxu1 %v418_v2  ;;  %v424_v8 = vld [vmem:[#allocation6 + $0x18] sm:$0xff]   ;;  %v426_v10 = vld [vmem:[#allocation6 + $0x20] sm:$0xff]   ;;  %v427_v11 = vld [vmem:[#allocation8 + $0x28] sm:$0xff]  }
  0x3a   :  { %371 = vmatprep.subr.bf16.mxu0 %v538_v0  ;;  %391 = vmatprep.subr.bf16.mxu1 %v538_v0  ;;  %v428_v12 = vld [vmem:[#allocation6 + $0x28] sm:$0xff]   ;;  %v429_v13 = vld [vmem:[#allocation8 + $0x30] sm:$0xff]   ;;  %v431_v15 = vld [vmem:[#allocation8 + $0x38] sm:$0xff]   ;;  %v311_v42 = vsub.s32 %v308_v40, %v310_v41 }
  0x3b   :  { %v430_v14 = vld [vmem:[#allocation6 + $0x30] sm:$0xff]   ;;  %v432_v16 = vld [vmem:[#allocation6 + $0x38] sm:$0xff]  }
  0x3c   :  { %v85_v17 = vld [vmem:[%s648_s1] sm:$0xf] }
  0x3d   :  { %372 = vmatpush3.bf16.msra.mxu0 %v419_v3  ;;  %392 = vmatpush3.bf16.msra.mxu1 %v420_v4  ;;  %v68_v18 = vld [vmem:[#allocation3] sm:$0xf] }
  0x3e   :  { %373 = vmatprep.subr.bf16.mxu0 %v538_v0  ;;  %393 = vmatprep.subr.bf16.mxu1 %v538_v0  ;;  %v348_v21 = vld [vmem:[%s651_s4] ss:$0 sm:$0xff]  ;;  %s540_s4 = smov [#allocation9]  }
  0x3f   :  { %v349_v30 = vld [vmem:[%s652_s5] ss:$0 sm:$0xff]  ;;  %s322_s5 = sshll.u32 %s540_s4, 4  ;;  %s323_s5 = int_to_ptr.vmem [resolvable:$true] %s322_s5 }
  0x40   :  { %s505_s20 = scalar_lea.vmem %s323_s5, 16  ;;  %s509_s6 = scalar_lea.vmem %s323_s5, 32 }
  0x41   :  { %374 = vmatpush3.bf16.msra.mxu0 %v421_v5  ;;  %394 = vmatpush3.bf16.msra.mxu1 %v422_v6  ;;  %p506_p10 = scmp.ne.s32.totalorder %s323_s5, %s505_s20  ;;  %p510_p11 = scmp.lt.s32.totalorder %s323_s5, %s323_s5 }
  0x42   :  { %375 = vmatprep.subr.bf16.mxu0 %v538_v0  ;;  %395 = vmatprep.subr.bf16.mxu1 %v538_v0  ;;  %p511_p12 = scmp.lt.s32.totalorder %s509_s6, %s505_s20 }
  0x44   :  { %p512_p13 = por %p511_p12, %p510_p11 }
  0x45   :  { %376 = vmatpush3.bf16.msra.mxu0 %v423_v7  ;;  %396 = vmatpush3.bf16.msra.mxu1 %v424_v8 }
  0x46   :  { %377 = vmatprep.subr.bf16.mxu0 %v538_v0  ;;  %397 = vmatprep.subr.bf16.mxu1 %v538_v0  ;;  %p513_p0 = pnand %p512_p13, %p506_p10 }
  0x49   :  { %378 = vmatpush3.bf16.msra.mxu0 %v425_v9  ;;  %398 = vmatpush3.bf16.msra.mxu1 %v426_v10 }
  0x4a   :  { %379 = vmatprep.subr.bf16.mxu0 %v538_v0  ;;  %399 = vmatprep.subr.bf16.mxu1 %v538_v0 }
  0x4d   :  { %380 = vmatpush3.bf16.msra.mxu0 %v427_v11  ;;  %400 = vmatpush3.bf16.msra.mxu1 %v428_v12 }
  0x4e   :  { %381 = vmatprep.subr.bf16.mxu0 %v538_v0  ;;  %401 = vmatprep.subr.bf16.mxu1 %v538_v0 }
  0x51   :  { %382 = vmatpush3.bf16.msra.mxu0 %v429_v13  ;;  %402 = vmatpush3.bf16.msra.mxu1 %v430_v14 }
  0x52   :  { %383 = vmatprep.subr.bf16.mxu0 %v538_v0  ;;  %403 = vmatprep.subr.bf16.mxu1 %v538_v0 }
  0x55   :  { %384 = vmatpush3.bf16.msra.mxu0 %v431_v15  ;;  %404 = vmatpush3.bf16.msra.mxu1 %v432_v16 }
  0x58   :  { %386 = vmatmul.mubr.bf16.vlgmr.msra.gmra.mrb[0].mxu0 %v85_v17  ;;  %406 = vmatmul.mubr.bf16.vlgmr.msra.gmra.mrb[0].mxu1 %v68_v18 }
 0x12b   :  { %v184_v19 = vpop.f32.mrb[0].mxu0  ;;  %v272_v20 = vpop.f32.mrb[0].mxu1 }
 0x12c   :  { %v387_v22 = vpop.f32.mrb[1].mxu0  ;;  %v273_v23 = vadd.f32 %v272_v20, %v184_v19  ;;  %v407_v24 = vpop.f32.mrb[1].mxu1 }
 0x12d   :  { %v187_v25 = vpop.f32.mrb[2].mxu0  ;;  %v275_v26 = vpop.f32.mrb[2].mxu1 }
 0x12e   :  { %v388_v27 = vpop.f32.mrb[3].mxu0  ;;  %v285_v28 = vadd.f32 %v348_v21, %v273_v23  ;;  %v408_v29 = vpop.f32.mrb[3].mxu1 }
 0x130   :  { %433 = vtanh.f32 %v285_v28 }
 0x13a   :  { %v434_v31 = vpop.eup %433 }
 0x13b   :  { %v294_v32 = vmul.f32 %v434_v31, %v349_v30 }
 0x13d   :  { %295 = vadd.xlane.f32.xlu0 %v294_v32 }
 0x1ca   :  { %v296_v34 = vpop.xlane.xlu0 %295 }
 0x1cb   :  { %v299_v35 = vadd.f32 %v298_v33, %v296_v34 }
 0x1cd   :  { %v350_v36 = vmul.f32 -1.442695, %v299_v35 }
 0x1cf   :  { %435 = vpow2.f32 %v350_v36 }
 0x1d9   :  { %v436_v37 = vpop.eup %435 }
 0x1da   :  { %v303_v38 = vadd.f32 1.0, %v436_v37 }
 0x1dc   :  { %437 = vrcp.f32 %v303_v38 }
 0x1e6   :  { %v438_v43 = vpop.eup %437 }
 0x1e7   :  { %v312_v44 = vrot.slane %v438_v43, %v311_v42 }
 0x1e9   :  { %315 = vst.msk [vmem:[#allocation9] sm:$0x1] %vm314_vm1, %v312_v44 }
 0x1ea   :  { %516 = shalt.err (!%p513_p0)
}
 0x1eb   :  { %s517_s23 = scalar_lea.hbm %s654_s7, 16 }
 0x1ec   :  { %p518_p1 = scmp.ne.s32.totalorder %s654_s7, %s517_s23  ;;  %p521_p2 = scmp.lt.u32.totalorder %s517_s23, %s654_s7 }
 0x1ee   :  { %p523_p3 = pnand %p521_p2, %p518_p1 }
 0x1f0   :  { %526 = shalt.err (!%p523_p3)
}
 0x1f1   :  { %325 = dma.vmem_to_hbm [thread:$0]  %s323_s5, 16, %s654_s7, [#allocation5]  }
 0x1f2   :  { %531 = dma.done.wait [#allocation5], 16  }
 0x1f3   :  { %532 = vsyncadd [#allocation5], 4294967280 }
 0x1f4   :  { %329 = vsyncpa [#allocation4], 1 }
 0x1f5   :  { %330 = vsyncpa [#allocation7], 1 }
 0x1f6   :  { %331 = vsyncpa [#allocation5], 1 }

</bundles_post_ra>
